<compile_context>
chip_gen: v6e
topology: v6e:2x2x1
jax: 0.10.0
libtpu: 0.0.40
codegen_flags: <defaults>
</compile_context>

<pallas_src>
import jax
import jax.numpy as jnp
from jax import lax
from jax.experimental import pallas as pl
from jax.experimental.pallas import tpu as pltpu

BN_EPS = 1e-5
_VMEM_LIMIT = 32 * 1024 * 1024        # scoped VMEM limit: raises v5e's 16 MiB, fits v7x
_TILE_VMEM_BUDGET = 16 * 1024 * 1024  # ~half the limit -> headroom for values / spills
_TS_CAP = 4096                        # diminishing returns beyond this tile width


def _stats_kernel(x1_ref, x2_ref, w1_ref, w2_ref, s1_ref, s2_ref, q1_ref, q2_ref):
    """Pass 1: per-(batch, spatial-tile) sum / sum-of-squares of the conv output.

    x1_ref/x2_ref: (1, C_in, TS) bf16   stride-2 phase (0,0) / (1,1) of relu(x)
    w1_ref/w2_ref: (C_half, C_in) bf16  1x1 conv weights of the two branches
    s*_ref/q*_ref: (1, 1, C_half, 1) f32 partial stats (one block per grid step)
    """
    y1 = jnp.dot(w1_ref[...], x1_ref[0], preferred_element_type=jnp.float32)  # MXU
    y2 = jnp.dot(w2_ref[...], x2_ref[0], preferred_element_type=jnp.float32)  # MXU
    s1_ref[0, 0] = jnp.sum(y1, axis=1, keepdims=True)                         # XLU
    s2_ref[0, 0] = jnp.sum(y2, axis=1, keepdims=True)
    q1_ref[0, 0] = jnp.sum(y1 * y1, axis=1, keepdims=True)
    q2_ref[0, 0] = jnp.sum(y2 * y2, axis=1, keepdims=True)


def _apply_kernel(x1_ref, x2_ref, w1_ref, w2_ref, scale_ref, shift_ref, o_ref):
    """Pass 2: recompute the conv and apply the folded BatchNorm affine.

    scale_ref/shift_ref: (2, C_half, 1) f32 per-channel folded BN scale / shift.
    o_ref: (1, 2, C_half, TS) f32 -- branch axis kept separate so both stores are
    full (C_half, TS) lane-dense slabs (no partial/sub-sublane stores).
    """
    y1 = jnp.dot(w1_ref[...], x1_ref[0], preferred_element_type=jnp.float32)
    y2 = jnp.dot(w2_ref[...], x2_ref[0], preferred_element_type=jnp.float32)
    o_ref[0, 0] = y1 * scale_ref[0] + shift_ref[0]
    o_ref[0, 1] = y2 * scale_ref[1] + shift_ref[1]


def _pick_spatial_tile(s_real, c_in, c_out):
    """Pick the lane-axis tile TS and padded spatial size.

    Approximate per-lane VMEM bytes of one grid step (double-buffered blocks):
      inputs  : 2 arrays * c_in * 2B * 2 buffers = 8*c_in
      output  : c_out * 4B * 2 buffers           = 8*c_out
      f32 y1/y2 intermediates                    = 4*c_out
    """
    bytes_per_lane = 8 * c_in + 12 * c_out
    ts_max = _TILE_VMEM_BUDGET // max(bytes_per_lane, 1)
    ts_max = min(ts_max, _TS_CAP)
    if s_real <= ts_max:
        return s_real, s_real              # single tile; block == full dim (no 128 rule)
    ts_max = max(128, (ts_max // 128) * 128)
    # Prefer a multiple of 128 that divides s_real exactly: avoids the jnp.pad of the
    # inputs AND the strided output slice (each is an extra HBM round trip).
    for ts in range(ts_max, 255, -128):
        if s_real % ts == 0:
            return ts, s_real
    ts = ts_max
    s_pad = ((s_real + ts - 1) // ts) * ts
    return ts, s_pad


@jax.jit
def factorized_reduce(x, w1, w2, gamma, beta):
    """x: (N, C_in, H, W) float32, NCHW.
    w1, w2: (C_half, C_in) conv weights (PyTorch (C_half, C_in, 1, 1) squeezed).
    gamma, beta: (C_out,) BatchNorm affine params.
    Returns (N, C_out, H//2, W//2) float32 NCHW.
    """
    n, c_in, h, w = x.shape
    assert h % 2 == 0 and w % 2 == 0, "FactorizedReduce requires even spatial dims"
    c_half = w1.shape[0]
    c_out = 2 * c_half
    ho, wo = h // 2, w // 2
    s_real = ho * wo
    ts, s_pad = _pick_spatial_tile(s_real, c_in, c_out)
    s_tiles = s_pad // ts

    # ReLU + stride-2 phase gather + bf16 cast, fused by XLA into one pass over x.
    # Branch 1 samples phase (0,0); branch 2 (conv on x[:, :, 1:, 1:]) samples (1,1).
    r = jnp.maximum(x.astype(jnp.float32), 0.0)
    x1 = r[:, :, ::2, ::2].reshape(n, c_in, s_real).astype(jnp.bfloat16)
    x2 = r[:, :, 1::2, 1::2].reshape(n, c_in, s_real).astype(jnp.bfloat16)
    if s_pad != s_real:
        # Zero padding is stats-safe: W @ 0 = 0 contributes nothing to sum / sum-sq.
        pad = ((0, 0), (0, 0), (0, s_pad - s_real))
        x1 = jnp.pad(x1, pad)
        x2 = jnp.pad(x2, pad)

    w1b = w1.astype(jnp.bfloat16)
    w2b = w2.astype(jnp.bfloat16)

    itemsize_in = 2   # bf16
    cost1 = pl.CostEstimate(
        flops=2 * c_out * c_in * s_pad * n + 4 * c_out * s_pad * n,
        transcendentals=0,
        bytes_accessed=(2 * n * c_in * s_pad * itemsize_in
                        + 2 * c_half * c_in * itemsize_in
                        + 4 * n * s_tiles * c_half * 4),
    )

    stats_shape = jax.ShapeDtypeStruct((n, s_tiles, c_half, 1), jnp.float32)
    s1, s2, q1, q2 = pl.pallas_call(
        _stats_kernel,
        out_shape=(stats_shape, stats_shape, stats_shape, stats_shape),
        grid_spec=pltpu.PrefetchScalarGridSpec(
            num_scalar_prefetch=0,
            grid=(n, s_tiles),
            in_specs=[
                pl.BlockSpec((1, c_in, ts), lambda b, s: (b, 0, s)),
                pl.BlockSpec((1, c_in, ts), lambda b, s: (b, 0, s)),
                pl.BlockSpec((c_half, c_in), lambda b, s: (0, 0)),
                pl.BlockSpec((c_half, c_in), lambda b, s: (0, 0)),
            ],
            out_specs=[
                pl.BlockSpec((1, 1, c_half, 1), lambda b, s: (b, s, 0, 0)),
                pl.BlockSpec((1, 1, c_half, 1), lambda b, s: (b, s, 0, 0)),
                pl.BlockSpec((1, 1, c_half, 1), lambda b, s: (b, s, 0, 0)),
                pl.BlockSpec((1, 1, c_half, 1), lambda b, s: (b, s, 0, 0)),
            ],
        ),
        compiler_params=pltpu.CompilerParams(
            dimension_semantics=("parallel", "parallel"),
            vmem_limit_bytes=_VMEM_LIMIT,
        ),
        cost_estimate=cost1,
    )(x1, x2, w1b, w2b)

    # Tiny JAX epilogue: reduce partials, fold batch stats + gamma/beta into
    # per-channel scale/shift, laid out (branch, C_half, 1) to match the kernel.
    m_count = jnp.float32(n * s_real)
    sum_h = jnp.stack([jnp.sum(s1, axis=(0, 1)), jnp.sum(s2, axis=(0, 1))])   # (2,Ch,1)
    sq_h = jnp.stack([jnp.sum(q1, axis=(0, 1)), jnp.sum(q2, axis=(0, 1))])
    mean = sum_h / m_count
    var = jnp.maximum(sq_h / m_count - mean * mean, 0.0)
    inv_std = lax.rsqrt(var + BN_EPS)
    g = gamma.astype(jnp.float32).reshape(2, c_half, 1)
    b_ = beta.astype(jnp.float32).reshape(2, c_half, 1)
    scale = g * inv_std
    shift = b_ - mean * scale

    cost2 = pl.CostEstimate(
        flops=2 * c_out * c_in * s_pad * n + 2 * c_out * s_pad * n,
        transcendentals=0,
        bytes_accessed=(2 * n * c_in * s_pad * itemsize_in
                        + 2 * c_half * c_in * itemsize_in
                        + 2 * 2 * c_half * 4
                        + n * c_out * s_pad * 4),
    )

    out = pl.pallas_call(
        _apply_kernel,
        out_shape=jax.ShapeDtypeStruct((n, 2, c_half, s_pad), jnp.float32),
        grid_spec=pltpu.PrefetchScalarGridSpec(
            num_scalar_prefetch=0,
            grid=(n, s_tiles),
            in_specs=[
                pl.BlockSpec((1, c_in, ts), lambda b, s: (b, 0, s)),
                pl.BlockSpec((1, c_in, ts), lambda b, s: (b, 0, s)),
                pl.BlockSpec((c_half, c_in), lambda b, s: (0, 0)),
                pl.BlockSpec((c_half, c_in), lambda b, s: (0, 0)),
                pl.BlockSpec((2, c_half, 1), lambda b, s: (0, 0, 0)),
                pl.BlockSpec((2, c_half, 1), lambda b, s: (0, 0, 0)),
            ],
            out_specs=pl.BlockSpec((1, 2, c_half, ts), lambda b, s: (b, 0, 0, s)),
        ),
        compiler_params=pltpu.CompilerParams(
            dimension_semantics=("parallel", "parallel"),
            vmem_limit_bytes=_VMEM_LIMIT,
        ),
        cost_estimate=cost2,
    )(x1, x2, w1b, w2b, scale, shift)

    # (N, 2, C_half, S) -> (N, C_out, Ho, Wo); when ts | s_real this is a free
    # reshape (no slice copy).
    if s_pad != s_real:
        out = out[:, :, :, :s_real]
    return out.reshape(n, c_out, ho, wo)


def _reference(x, w1, w2, gamma, beta):
    # Pure-JAX f32 reference matching the PyTorch module (training-mode BatchNorm).
    r = jnp.maximum(x, 0.0)
    y1 = jnp.einsum("oc,nchw->nohw", w1, r[:, :, ::2, ::2])
    y2 = jnp.einsum("oc,nchw->nohw", w2, r[:, :, 1::2, 1::2])
    y = jnp.concatenate([y1, y2], axis=1)
    mean = jnp.mean(y, axis=(0, 2, 3), keepdims=True)
    var = jnp.mean((y - mean) ** 2, axis=(0, 2, 3), keepdims=True)
    yhat = (y - mean) * lax.rsqrt(var + BN_EPS)
    return yhat * gamma.reshape(1, -1, 1, 1) + beta.reshape(1, -1, 1, 1)


if __name__ == "__main__":
    key = jax.random.PRNGKey(0)
    k_x, k_w1, k_w2 = jax.random.split(key, 3)

    N, C_IN, H, W = 2, 4, 16, 16
    C_OUT = 8
    C_HALF = C_OUT // 2

    x = jax.random.normal(k_x, (N, C_IN, H, W), dtype=jnp.float32)
    # Conv2d(C_IN, C_HALF, 1, stride=2, bias=False) weights, (C_half, C_in)
    w1 = jax.random.normal(k_w1, (C_HALF, C_IN), dtype=jnp.float32) * 0.1
    w2 = jax.random.normal(k_w2, (C_HALF, C_IN), dtype=jnp.float32) * 0.1
    # BatchNorm2d(C_OUT, affine=True) init: gamma=1, beta=0
    gamma = jnp.ones((C_OUT,), dtype=jnp.float32)
    beta = jnp.zeros((C_OUT,), dtype=jnp.float32)

    out = factorized_reduce(x, w1, w2, gamma, beta)
    jax.block_until_ready(out)

    ref = _reference(x, w1, w2, gamma, beta)
    assert out.shape == (N, C_OUT, H // 2, W // 2)
    max_err = float(jnp.max(jnp.abs(out - ref)))
    # bf16 MXU operands -> tolerance relaxed vs the f32 version (review note).
    assert jnp.allclose(out, ref, atol=5e-2, rtol=5e-2), max_err

    print("KERNEL_OK")
</pallas_src>

<mosaic_0001>
module attributes {stable_mosaic.version = 11 : i64} {
  func.func @_stats_kernel(%arg0: i32, %arg1: i32, %arg2: memref<1x4x64xbf16, #tpu.memory_space<vmem>>, %arg3: memref<1x4x64xbf16, #tpu.memory_space<vmem>>, %arg4: memref<4x4xbf16, #tpu.memory_space<vmem>>, %arg5: memref<4x4xbf16, #tpu.memory_space<vmem>>, %arg6: memref<1x1x4x1xf32, #tpu.memory_space<vmem>>, %arg7: memref<1x1x4x1xf32, #tpu.memory_space<vmem>>, %arg8: memref<1x1x4x1xf32, #tpu.memory_space<vmem>>, %arg9: memref<1x1x4x1xf32, #tpu.memory_space<vmem>>) attributes {dimension_semantics = [#tpu.dimension_semantics<parallel>, #tpu.dimension_semantics<parallel>], iteration_bounds = array<i64: 2, 1>, scalar_prefetch = 0 : i64, scratch_operands = 0 : i64, tpu.core_type = #tpu.core_type<tc>, window_params = [{transform_indices = @transform_0, window_bounds = array<i64: 1, 4, 64>}, {transform_indices = @transform_1, window_bounds = array<i64: 1, 4, 64>}, {pipeline_mode = #tpu.pipeline_mode<synchronous>, transform_indices = @transform_2, window_bounds = array<i64: 4, 4>}, {pipeline_mode = #tpu.pipeline_mode<synchronous>, transform_indices = @transform_3, window_bounds = array<i64: 4, 4>}, {transform_indices = @transform_4, window_bounds = array<i64: 1, 1, 4, 1>}, {transform_indices = @transform_5, window_bounds = array<i64: 1, 1, 4, 1>}, {transform_indices = @transform_6, window_bounds = array<i64: 1, 1, 4, 1>}, {transform_indices = @transform_7, window_bounds = array<i64: 1, 1, 4, 1>}]} {
    %c0 = arith.constant 0 : index
    %c0_0 = arith.constant 0 : index
    %0 = vector.load %arg4[%c0, %c0_0] : memref<4x4xbf16, #tpu.memory_space<vmem>>, vector<4x4xbf16>
    %c0_1 = arith.constant 0 : index
    %c0_2 = arith.constant 0 : index
    %c0_3 = arith.constant 0 : index
    %1 = vector.load %arg2[%c0_1, %c0_2, %c0_3] : memref<1x4x64xbf16, #tpu.memory_space<vmem>>, vector<1x4x64xbf16>
    %2 = vector.shape_cast %1 : vector<1x4x64xbf16> to vector<4x64xbf16>
    %cst = arith.constant dense<0.000000e+00> : vector<4x64xf32>
    %3 = tpu.matmul %0, %2, %cst {dimension_numbers = #tpu.dot_dimension_numbers<[1], [0], [0], [1], [0, 0, 1, 1], [], []>} : vector<4x4xbf16>, vector<4x64xbf16>, vector<4x64xf32> -> vector<4x64xf32>
    %c0_4 = arith.constant 0 : index
    %c0_5 = arith.constant 0 : index
    %4 = vector.load %arg5[%c0_4, %c0_5] : memref<4x4xbf16, #tpu.memory_space<vmem>>, vector<4x4xbf16>
    %c0_6 = arith.constant 0 : index
    %c0_7 = arith.constant 0 : index
    %c0_8 = arith.constant 0 : index
    %5 = vector.load %arg3[%c0_6, %c0_7, %c0_8] : memref<1x4x64xbf16, #tpu.memory_space<vmem>>, vector<1x4x64xbf16>
    %6 = vector.shape_cast %5 : vector<1x4x64xbf16> to vector<4x64xbf16>
    %cst_9 = arith.constant dense<0.000000e+00> : vector<4x64xf32>
    %7 = tpu.matmul %4, %6, %cst_9 {dimension_numbers = #tpu.dot_dimension_numbers<[1], [0], [0], [1], [0, 0, 1, 1], [], []>} : vector<4x4xbf16>, vector<4x64xbf16>, vector<4x64xf32> -> vector<4x64xf32>
    %cst_10 = arith.constant dense<0.000000e+00> : vector<4xf32>
    %8 = vector.multi_reduction <add>, %3, %cst_10 [1] : vector<4x64xf32> to vector<4xf32>
    %9 = vector.shape_cast %8 : vector<4xf32> to vector<4x1xf32>
    %c0_11 = arith.constant 0 : index
    %c0_12 = arith.constant 0 : index
    %c0_13 = arith.constant 0 : index
    %c0_14 = arith.constant 0 : index
    %10 = vector.load %arg6[%c0_11, %c0_12, %c0_13, %c0_14] : memref<1x1x4x1xf32, #tpu.memory_space<vmem>>, vector<1x1x4x1xf32>
    %11 = vector.shape_cast %10 : vector<1x1x4x1xf32> to vector<4x1xf32>
    %12 = vector.shape_cast %9 : vector<4x1xf32> to vector<1x1x4x1xf32>
    tpu.vector_store %arg6[%c0_11, %c0_12, %c0_13, %c0_14], %12 {strides = array<i32>} : memref<1x1x4x1xf32, #tpu.memory_space<vmem>>, vector<1x1x4x1xf32>,
    %cst_15 = arith.constant dense<0.000000e+00> : vector<4xf32>
    %13 = vector.multi_reduction <add>, %7, %cst_15 [1] : vector<4x64xf32> to vector<4xf32>
    %14 = vector.shape_cast %13 : vector<4xf32> to vector<4x1xf32>
    %c0_16 = arith.constant 0 : index
    %c0_17 = arith.constant 0 : index
    %c0_18 = arith.constant 0 : index
    %c0_19 = arith.constant 0 : index
    %15 = vector.load %arg7[%c0_16, %c0_17, %c0_18, %c0_19] : memref<1x1x4x1xf32, #tpu.memory_space<vmem>>, vector<1x1x4x1xf32>
    %16 = vector.shape_cast %15 : vector<1x1x4x1xf32> to vector<4x1xf32>
    %17 = vector.shape_cast %14 : vector<4x1xf32> to vector<1x1x4x1xf32>
    tpu.vector_store %arg7[%c0_16, %c0_17, %c0_18, %c0_19], %17 {strides = array<i32>} : memref<1x1x4x1xf32, #tpu.memory_space<vmem>>, vector<1x1x4x1xf32>,
    %18 = arith.mulf %3, %3 : vector<4x64xf32>
    %cst_20 = arith.constant dense<0.000000e+00> : vector<4xf32>
    %19 = vector.multi_reduction <add>, %18, %cst_20 [1] : vector<4x64xf32> to vector<4xf32>
    %20 = vector.shape_cast %19 : vector<4xf32> to vector<4x1xf32>
    %c0_21 = arith.constant 0 : index
    %c0_22 = arith.constant 0 : index
    %c0_23 = arith.constant 0 : index
    %c0_24 = arith.constant 0 : index
    %21 = vector.load %arg8[%c0_21, %c0_22, %c0_23, %c0_24] : memref<1x1x4x1xf32, #tpu.memory_space<vmem>>, vector<1x1x4x1xf32>
    %22 = vector.shape_cast %21 : vector<1x1x4x1xf32> to vector<4x1xf32>
    %23 = vector.shape_cast %20 : vector<4x1xf32> to vector<1x1x4x1xf32>
    tpu.vector_store %arg8[%c0_21, %c0_22, %c0_23, %c0_24], %23 {strides = array<i32>} : memref<1x1x4x1xf32, #tpu.memory_space<vmem>>, vector<1x1x4x1xf32>,
    %24 = arith.mulf %7, %7 : vector<4x64xf32>
    %cst_25 = arith.constant dense<0.000000e+00> : vector<4xf32>
    %25 = vector.multi_reduction <add>, %24, %cst_25 [1] : vector<4x64xf32> to vector<4xf32>
    %26 = vector.shape_cast %25 : vector<4xf32> to vector<4x1xf32>
    %c0_26 = arith.constant 0 : index
    %c0_27 = arith.constant 0 : index
    %c0_28 = arith.constant 0 : index
    %c0_29 = arith.constant 0 : index
    %27 = vector.load %arg9[%c0_26, %c0_27, %c0_28, %c0_29] : memref<1x1x4x1xf32, #tpu.memory_space<vmem>>, vector<1x1x4x1xf32>
    %28 = vector.shape_cast %27 : vector<1x1x4x1xf32> to vector<4x1xf32>
    %29 = vector.shape_cast %26 : vector<4x1xf32> to vector<1x1x4x1xf32>
    tpu.vector_store %arg9[%c0_26, %c0_27, %c0_28, %c0_29], %29 {strides = array<i32>} : memref<1x1x4x1xf32, #tpu.memory_space<vmem>>, vector<1x1x4x1xf32>,
    return
  }
  func.func @transform_0(%arg0: i32, %arg1: i32) -> (i32, i32, i32) {
    %c0_i32 = arith.constant 0 : i32
    %c0_i32_0 = arith.constant 0 : i32
    return %arg0, %c0_i32, %arg1 : i32, i32, i32
  }
  func.func @transform_1(%arg0: i32, %arg1: i32) -> (i32, i32, i32) {
    %c0_i32 = arith.constant 0 : i32
    %c0_i32_0 = arith.constant 0 : i32
    return %arg0, %c0_i32, %arg1 : i32, i32, i32
  }
  func.func @transform_2(%arg0: i32, %arg1: i32) -> (i32, i32) {
    %c0_i32 = arith.constant 0 : i32
    %c0_i32_0 = arith.constant 0 : i32
    %c0_i32_1 = arith.constant 0 : i32
    return %c0_i32, %c0_i32_0 : i32, i32
  }
  func.func @transform_3(%arg0: i32, %arg1: i32) -> (i32, i32) {
    %c0_i32 = arith.constant 0 : i32
    %c0_i32_0 = arith.constant 0 : i32
    %c0_i32_1 = arith.constant 0 : i32
    return %c0_i32, %c0_i32_0 : i32, i32
  }
  func.func @transform_4(%arg0: i32, %arg1: i32) -> (i32, i32, i32, i32) {
    %c0_i32 = arith.constant 0 : i32
    %c0_i32_0 = arith.constant 0 : i32
    %c0_i32_1 = arith.constant 0 : i32
    return %arg0, %arg1, %c0_i32, %c0_i32_0 : i32, i32, i32, i32
  }
  func.func @transform_5(%arg0: i32, %arg1: i32) -> (i32, i32, i32, i32) {
    %c0_i32 = arith.constant 0 : i32
    %c0_i32_0 = arith.constant 0 : i32
    %c0_i32_1 = arith.constant 0 : i32
    return %arg0, %arg1, %c0_i32, %c0_i32_0 : i32, i32, i32, i32
  }
  func.func @transform_6(%arg0: i32, %arg1: i32) -> (i32, i32, i32, i32) {
    %c0_i32 = arith.constant 0 : i32
    %c0_i32_0 = arith.constant 0 : i32
    %c0_i32_1 = arith.constant 0 : i32
    return %arg0, %arg1, %c0_i32, %c0_i32_0 : i32, i32, i32, i32
  }
  func.func @transform_7(%arg0: i32, %arg1: i32) -> (i32, i32, i32, i32) {
    %c0_i32 = arith.constant 0 : i32
    %c0_i32_0 = arith.constant 0 : i32
    %c0_i32_1 = arith.constant 0 : i32
    return %arg0, %arg1, %c0_i32, %c0_i32_0 : i32, i32, i32, i32
  }
}

module attributes {stable_mosaic.version = 11 : i64} {
  func.func @_apply_kernel(%arg0: i32, %arg1: i32, %arg2: memref<1x4x64xbf16, #tpu.memory_space<vmem>>, %arg3: memref<1x4x64xbf16, #tpu.memory_space<vmem>>, %arg4: memref<4x4xbf16, #tpu.memory_space<vmem>>, %arg5: memref<4x4xbf16, #tpu.memory_space<vmem>>, %arg6: memref<2x4x1xf32, #tpu.memory_space<vmem>>, %arg7: memref<2x4x1xf32, #tpu.memory_space<vmem>>, %arg8: memref<1x2x4x64xf32, #tpu.memory_space<vmem>>) attributes {dimension_semantics = [#tpu.dimension_semantics<parallel>, #tpu.dimension_semantics<parallel>], iteration_bounds = array<i64: 2, 1>, scalar_prefetch = 0 : i64, scratch_operands = 0 : i64, tpu.core_type = #tpu.core_type<tc>, window_params = [{transform_indices = @transform_0, window_bounds = array<i64: 1, 4, 64>}, {transform_indices = @transform_1, window_bounds = array<i64: 1, 4, 64>}, {pipeline_mode = #tpu.pipeline_mode<synchronous>, transform_indices = @transform_2, window_bounds = array<i64: 4, 4>}, {pipeline_mode = #tpu.pipeline_mode<synchronous>, transform_indices = @transform_3, window_bounds = array<i64: 4, 4>}, {pipeline_mode = #tpu.pipeline_mode<synchronous>, transform_indices = @transform_4, window_bounds = array<i64: 2, 4, 1>}, {pipeline_mode = #tpu.pipeline_mode<synchronous>, transform_indices = @transform_5, window_bounds = array<i64: 2, 4, 1>}, {transform_indices = @transform_6, window_bounds = array<i64: 1, 2, 4, 64>}]} {
    %c0 = arith.constant 0 : index
    %c0_0 = arith.constant 0 : index
    %0 = vector.load %arg4[%c0, %c0_0] : memref<4x4xbf16, #tpu.memory_space<vmem>>, vector<4x4xbf16>
    %c0_1 = arith.constant 0 : index
    %c0_2 = arith.constant 0 : index
    %c0_3 = arith.constant 0 : index
    %1 = vector.load %arg2[%c0_1, %c0_2, %c0_3] : memref<1x4x64xbf16, #tpu.memory_space<vmem>>, vector<1x4x64xbf16>
    %2 = vector.shape_cast %1 : vector<1x4x64xbf16> to vector<4x64xbf16>
    %cst = arith.constant dense<0.000000e+00> : vector<4x64xf32>
    %3 = tpu.matmul %0, %2, %cst {dimension_numbers = #tpu.dot_dimension_numbers<[1], [0], [0], [1], [0, 0, 1, 1], [], []>} : vector<4x4xbf16>, vector<4x64xbf16>, vector<4x64xf32> -> vector<4x64xf32>
    %c0_4 = arith.constant 0 : index
    %c0_5 = arith.constant 0 : index
    %4 = vector.load %arg5[%c0_4, %c0_5] : memref<4x4xbf16, #tpu.memory_space<vmem>>, vector<4x4xbf16>
    %c0_6 = arith.constant 0 : index
    %c0_7 = arith.constant 0 : index
    %c0_8 = arith.constant 0 : index
    %5 = vector.load %arg3[%c0_6, %c0_7, %c0_8] : memref<1x4x64xbf16, #tpu.memory_space<vmem>>, vector<1x4x64xbf16>
    %6 = vector.shape_cast %5 : vector<1x4x64xbf16> to vector<4x64xbf16>
    %cst_9 = arith.constant dense<0.000000e+00> : vector<4x64xf32>
    %7 = tpu.matmul %4, %6, %cst_9 {dimension_numbers = #tpu.dot_dimension_numbers<[1], [0], [0], [1], [0, 0, 1, 1], [], []>} : vector<4x4xbf16>, vector<4x64xbf16>, vector<4x64xf32> -> vector<4x64xf32>
    %c0_10 = arith.constant 0 : index
    %c0_11 = arith.constant 0 : index
    %c0_12 = arith.constant 0 : index
    %8 = vector.load %arg6[%c0_10, %c0_11, %c0_12] : memref<2x4x1xf32, #tpu.memory_space<vmem>>, vector<1x4x1xf32>
    %9 = vector.shape_cast %8 : vector<1x4x1xf32> to vector<4x1xf32>
    %10 = vector.broadcast %9 : vector<4x1xf32> to vector<4x64xf32>
    %11 = arith.mulf %3, %10 : vector<4x64xf32>
    %c0_13 = arith.constant 0 : index
    %c0_14 = arith.constant 0 : index
    %c0_15 = arith.constant 0 : index
    %12 = vector.load %arg7[%c0_13, %c0_14, %c0_15] : memref<2x4x1xf32, #tpu.memory_space<vmem>>, vector<1x4x1xf32>
    %13 = vector.shape_cast %12 : vector<1x4x1xf32> to vector<4x1xf32>
    %14 = vector.broadcast %13 : vector<4x1xf32> to vector<4x64xf32>
    %15 = arith.addf %11, %14 : vector<4x64xf32>
    %c0_16 = arith.constant 0 : index
    %c0_17 = arith.constant 0 : index
    %c0_18 = arith.constant 0 : index
    %c0_19 = arith.constant 0 : index
    %16 = vector.load %arg8[%c0_16, %c0_17, %c0_18, %c0_19] : memref<1x2x4x64xf32, #tpu.memory_space<vmem>>, vector<1x1x4x64xf32>
    %17 = vector.shape_cast %16 : vector<1x1x4x64xf32> to vector<4x64xf32>
    %18 = vector.shape_cast %15 : vector<4x64xf32> to vector<1x1x4x64xf32>
    tpu.vector_store %arg8[%c0_16, %c0_17, %c0_18, %c0_19], %18 {strides = array<i32>} : memref<1x2x4x64xf32, #tpu.memory_space<vmem>>, vector<1x1x4x64xf32>,
    %c1 = arith.constant 1 : index
    %c0_20 = arith.constant 0 : index
    %c0_21 = arith.constant 0 : index
    %19 = vector.load %arg6[%c1, %c0_20, %c0_21] : memref<2x4x1xf32, #tpu.memory_space<vmem>>, vector<1x4x1xf32>
    %20 = vector.shape_cast %19 : vector<1x4x1xf32> to vector<4x1xf32>
    %21 = vector.broadcast %20 : vector<4x1xf32> to vector<4x64xf32>
    %22 = arith.mulf %7, %21 : vector<4x64xf32>
    %c1_22 = arith.constant 1 : index
    %c0_23 = arith.constant 0 : index
    %c0_24 = arith.constant 0 : index
    %23 = vector.load %arg7[%c1_22, %c0_23, %c0_24] : memref<2x4x1xf32, #tpu.memory_space<vmem>>, vector<1x4x1xf32>
    %24 = vector.shape_cast %23 : vector<1x4x1xf32> to vector<4x1xf32>
    %25 = vector.broadcast %24 : vector<4x1xf32> to vector<4x64xf32>
    %26 = arith.addf %22, %25 : vector<4x64xf32>
    %c0_25 = arith.constant 0 : index
    %c1_26 = arith.constant 1 : index
    %c0_27 = arith.constant 0 : index
    %c0_28 = arith.constant 0 : index
    %27 = vector.load %arg8[%c0_25, %c1_26, %c0_27, %c0_28] : memref<1x2x4x64xf32, #tpu.memory_space<vmem>>, vector<1x1x4x64xf32>
    %28 = vector.shape_cast %27 : vector<1x1x4x64xf32> to vector<4x64xf32>
    %29 = vector.shape_cast %26 : vector<4x64xf32> to vector<1x1x4x64xf32>
    tpu.vector_store %arg8[%c0_25, %c1_26, %c0_27, %c0_28], %29 {strides = array<i32>} : memref<1x2x4x64xf32, #tpu.memory_space<vmem>>, vector<1x1x4x64xf32>,
    return
  }
  func.func @transform_0(%arg0: i32, %arg1: i32) -> (i32, i32, i32) {
    %c0_i32 = arith.constant 0 : i32
    %c0_i32_0 = arith.constant 0 : i32
    return %arg0, %c0_i32, %arg1 : i32, i32, i32
  }
  func.func @transform_1(%arg0: i32, %arg1: i32) -> (i32, i32, i32) {
    %c0_i32 = arith.constant 0 : i32
    %c0_i32_0 = arith.constant 0 : i32
    return %arg0, %c0_i32, %arg1 : i32, i32, i32
  }
  func.func @transform_2(%arg0: i32, %arg1: i32) -> (i32, i32) {
    %c0_i32 = arith.constant 0 : i32
    %c0_i32_0 = arith.constant 0 : i32
    %c0_i32_1 = arith.constant 0 : i32
    return %c0_i32, %c0_i32_0 : i32, i32
  }
  func.func @transform_3(%arg0: i32, %arg1: i32) -> (i32, i32) {
    %c0_i32 = arith.constant 0 : i32
    %c0_i32_0 = arith.constant 0 : i32
    %c0_i32_1 = arith.constant 0 : i32
    return %c0_i32, %c0_i32_0 : i32, i32
  }
  func.func @transform_4(%arg0: i32, %arg1: i32) -> (i32, i32, i32) {
    %c0_i32 = arith.constant 0 : i32
    %c0_i32_0 = arith.constant 0 : i32
    %c0_i32_1 = arith.constant 0 : i32
    %c0_i32_2 = arith.constant 0 : i32
    return %c0_i32, %c0_i32_0, %c0_i32_1 : i32, i32, i32
  }
  func.func @transform_5(%arg0: i32, %arg1: i32) -> (i32, i32, i32) {
    %c0_i32 = arith.constant 0 : i32
    %c0_i32_0 = arith.constant 0 : i32
    %c0_i32_1 = arith.constant 0 : i32
    %c0_i32_2 = arith.constant 0 : i32
    return %c0_i32, %c0_i32_0, %c0_i32_1 : i32, i32, i32
  }
  func.func @transform_6(%arg0: i32, %arg1: i32) -> (i32, i32, i32, i32) {
    %c0_i32 = arith.constant 0 : i32
    %c0_i32_0 = arith.constant 0 : i32
    %c0_i32_1 = arith.constant 0 : i32
    return %arg0, %c0_i32, %c0_i32_0, %arg1 : i32, i32, i32, i32
  }
}

</mosaic_0001>

<bundles_post_ra>
// kernel: factorized_reduce.2
= control target key start
LH: loop header
LB: loop body
LE: loop exit
PB: predicated region body
PF: predicated region fallthrough
CT: control target
= control target key end

     0   :  { %s842_s24 = smov 0   ;;  %s844_s25 = smov 0   ;;  %s897_s0 = inlined_call_operand.vmem [shape: bf16[2,4,64], index: 0, kind: input, shape index: {}]   ;;  %s898_s1 = inlined_call_operand.vmem [shape: bf16[2,4,64], index: 1, kind: input, shape index: {}]   ;;  %s899_s2 = inlined_call_operand.vmem [shape: bf16[4,4], index: 2, kind: input, shape index: {}]   ;;  %s900_s3 = inlined_call_operand.vmem [shape: bf16[4,4], index: 3, kind: input, shape index: {}]   ;;  %s901_s4 = inlined_call_operand.vmem [shape: f32[2,1,4,1], index: 4, kind: output, shape index: {0}]   ;;  %s902_s5 = inlined_call_operand.vmem [shape: f32[2,1,4,1], index: 5, kind: output, shape index: {1}]   ;;  %s903_s6 = inlined_call_operand.vmem [shape: f32[2,1,4,1], index: 6, kind: output, shape index: {2}]   ;;  %s904_s7 = inlined_call_operand.vmem [shape: f32[2,1,4,1], index: 7, kind: output, shape index: {3}]  }
   0x1   :  { %s846_s26 = smov 0  }
   0x2 LB: > { %s30_s27 = sadd.s32 1, %s794_s25  ;;  %p723_p0 = scmp.ge.s32.totalorder %s798_s26, 1  ;;  %s798_s26 = sphi %s846_s26, %s18_s26   ;;  %s794_s25 = sphi %s844_s25, %s906_s25   ;;  %s790_s24 = sphi %s842_s24, %s905_s24  }
   0x3   : > { %p32_p1 = scmp.ge.s32.totalorder %s30_s27, 2  ;;  %p282_p2 = scmp.lt.s32.totalorder %s798_s26, 3 }
   0x5   : > { %s908_s27 = smov (%p32_p1, %s30_s27), 0  ;;  %p283_p3 = pnand %p723_p0, %p282_p2 }
   0x6   : > { %p346_p4 = scmp.lt.s32.totalorder (!%p283_p3), %s790_s24, 1 }
   0x7   : > { %286 = sbr.rel (%p283_p3) target bundleno = 359 (0x167), region = 36 }
   0xc   : > { %v800_v0 = vmov 0.0   ;;  %s910_s24 = smov (!%p346_p4, %s790_s24), 1  ;;  %vm801_vm0 = vmmov 0   ;;  %vm395_vm1 = vcmask 1041408   ;;  %v389_v5 = vld [vmem:[%s899_s2] sm:$0x3] }
   0xd   : > { %738 = vmatprep.subr.bf16.mxu0 %v800_v0  ;;  %744 = vmatprep.subr.bf16.mxu1 %v800_v0  ;;  %s724_s28 = sshll.u32 %s910_s24, 1  ;;  %vm391_vm2 = vcmask 31744   ;;  %v439_v6 = vld [vmem:[%s900_s3] sm:$0x3]  ;;  %vm487_vm3 = vcmask 519168   ;;  %s726_s16 = sshll.u32 %s910_s24, 2 }
   0xe   : > { %740 = vmatprep.mubr.msk.bf16.mxu0 %vm801_vm0, %v800_v0  ;;  %746 = vmatprep.mubr.msk.bf16.mxu1 %vm801_vm0, %v800_v0  ;;  %s352_s8 = scalar_lea.vmem %s897_s0, %s724_s28  ;;  %s359_s11 = scalar_lea.vmem %s898_s1, %s724_s28  ;;  %vm491_vm4 = vcmask 3072  }
   0xf   : > { %v390_v1 = vld [vmem:[%s352_s8] sm:$0x3]  ;;  %s366_s19 = scalar_lea.vmem %s901_s4, %s726_s16  ;;  %s380_s22 = scalar_lea.vmem %s903_s6, %s726_s16 }
  0x10   : > { %v440_v2 = vld [vmem:[%s359_s11] sm:$0x3]  ;;  %v397_v3 = vsel %vm395_vm1, %v390_v1, 0  ;;  %s373_s29 = scalar_lea.vmem %s902_s5, %s726_s16  ;;  %s387_s8 = scalar_lea.vmem %s904_s7, %s726_s16 }
  0x11   : > { %v445_v4 = vsel %vm395_vm1, %v440_v2, 0  ;;  %739 = vmatpush3.bf16.msra.mxu0 %v397_v3 }
  0x12   : > { %745 = vmatpush3.bf16.msra.mxu1 %v445_v4 }
  0x14   : > { %741 = vmatmul.mubr.msk.bf16.vlgmr.msra.gmra.mxu0 %vm391_vm2, %v389_v5 }
  0x15   : > { %747 = vmatmul.mubr.msk.bf16.vlgmr.msra.gmra.mxu1 %vm391_vm2, %v439_v6 }
  0xd4   : > { %v433_v7 = vpop.f32.mrf.mxu0 }
  0xd5   : > { %v481_v8 = vpop.f32.mrf.mxu1  ;;  %v488_v10 = vsel %vm487_vm3, %v433_v7, 0.0  ;;  %v497_v11 = vmul.f32 %v433_v7, %v433_v7 }
  0xd6   : > { %v502_v9 = vmul.f32 %v481_v8, %v481_v8  ;;  %489 = vadd.xlane.f32.xlu0 %v488_v10  ;;  %v742_v13 = vpop.f32.mrf.mxu0  ;;  %v493_v15 = vsel %vm487_vm3, %v481_v8, 0.0 }
  0xd7   : > { %v748_v12 = vpop.f32.mrf.mxu1  ;;  %v498_v14 = vsel %vm487_vm3, %v497_v11, 0.0 }
  0xd8   : > { %499 = vadd.xlane.f32.xlu1 %v498_v14  ;;  %v436_v17 = vpop.f32.mrf.mxu0  ;;  %v503_v18 = vsel %vm487_vm3, %v502_v9, 0.0 }
  0xd9   : > { %v484_v16 = vpop.f32.mrf.mxu1 }
  0xda   : > { %494 = vadd.xlane.f32.xlu0 %v493_v15  ;;  %v743_v20 = vpop.f32.mrf.mxu0 }
  0xdb   : > { %v749_v19 = vpop.f32.mrf.mxu1 }
  0xdc   : > { %504 = vadd.xlane.f32.xlu1 %v503_v18 }
 0x15f   : > { %v490_v21 = vpop.xlane.xlu0 %489 }
 0x160   : > { %492 = vst.msk [vmem:[%s366_s19] sm:$0xf] %vm491_vm4, %v490_v21 }
 0x161   : > { %v500_v22 = vpop.xlane.xlu1 %499 }
 0x162   : > { %501 = vst.msk [vmem:[%s380_s22] sm:$0xf] %vm491_vm4, %v500_v22 }
 0x163   : > { %v495_v23 = vpop.xlane.xlu0 %494 }
 0x164   : > { %496 = vst.msk [vmem:[%s373_s29] sm:$0xf] %vm491_vm4, %v495_v23 }
 0x165   : > { %v505_v24 = vpop.xlane.xlu1 %504 }
 0x166   : > { %506 = vst.msk [vmem:[%s387_s8] sm:$0xf] %vm491_vm4, %v505_v24 }
 0x167 PF: > { %s18_s26 = sadd.s32 1, %s798_s26   ;;  %s905_s24 = smov %s794_s25 }
 0x168   : > { %p15_p5 = scmp.ge.s32.totalorder %s18_s26, 4   ;;  %s906_s25 = smov %s908_s27 }
 0x16a   :  { %17 = sbr.rel (!%p15_p5) target bundleno = 2 (0x2), region = 105 }

// kernel: factorized_reduce.3
= control target key start
LH: loop header
LB: loop body
LE: loop exit
PB: predicated region body
PF: predicated region fallthrough
CT: control target
= control target key end

     0   :  { %s660_s21 = smov 0   ;;  %s662_s22 = smov 0   ;;  %s718_s0 = inlined_call_operand.vmem [shape: bf16[2,4,64], index: 0, kind: input, shape index: {}]   ;;  %s719_s1 = inlined_call_operand.vmem [shape: bf16[2,4,64], index: 1, kind: input, shape index: {}]   ;;  %s720_s2 = inlined_call_operand.vmem [shape: bf16[4,4], index: 2, kind: input, shape index: {}]   ;;  %s721_s3 = inlined_call_operand.vmem [shape: bf16[4,4], index: 3, kind: input, shape index: {}]   ;;  %s722_s4 = inlined_call_operand.vmem [shape: f32[2,4,1], index: 4, kind: input, shape index: {}]   ;;  %s723_s5 = inlined_call_operand.vmem [shape: f32[2,4,1], index: 5, kind: input, shape index: {}]   ;;  %s724_s6 = inlined_call_operand.vmem [shape: f32[2,2,4,64], index: 6, kind: output, shape index: {}]  }
   0x1   :  { %s664_s23 = smov 0  }
   0x2 LB: > { %s28_s24 = sadd.s32 1, %s616_s22  ;;  %p540_p0 = scmp.ge.s32.totalorder %s620_s23, 1  ;;  %s620_s23 = sphi %s664_s23, %s16_s23   ;;  %s616_s22 = sphi %s662_s22, %s726_s22   ;;  %s612_s21 = sphi %s660_s21, %s725_s21  }
   0x3   : > { %p30_p1 = scmp.ge.s32.totalorder %s28_s24, 2  ;;  %p244_p2 = scmp.lt.s32.totalorder %s620_s23, 3 }
   0x5   : > { %s728_s24 = smov (%p30_p1, %s28_s24), 0  ;;  %p245_p3 = pnand %p540_p0, %p244_p2 }
   0x6   : > { %p286_p4 = scmp.lt.s32.totalorder (!%p245_p3), %s612_s21, 1 }
   0x7   : > { %248 = sbr.rel (%p245_p3) target bundleno = 220 (0xdc), region = 44 }
   0xc   : > { %v622_v0 = vmov 0.0   ;;  %v407_v1 = vld [vmem:[%s722_s4] sm:$0xf]  ;;  %s730_s21 = smov (!%p286_p4, %s612_s21), 1  ;;  %vm623_vm0 = vmmov 0   ;;  %v624_v3 = vmov 0  }
   0xd   : > { %557 = vmatprep.subr.bf16.mxu0 %v622_v0  ;;  %563 = vmatprep.subr.bf16.mxu1 %v622_v0  ;;  %v414_v2 = vld [vmem:[%s723_s5] sm:$0xf]  ;;  %s541_s29 = sshll.u32 %s730_s21, 1  ;;  %vm315_vm1 = vcmask 1041408   ;;  %v547_v4 = vld [vmem:[%s722_s4 + $0x4] sm:$0xf] }
   0xe   : > { %559 = vmatprep.mubr.msk.bf16.mxu0 %vm623_vm0, %v622_v0  ;;  %565 = vmatprep.mubr.msk.bf16.mxu1 %vm623_vm0, %v622_v0  ;;  %s292_s8 = scalar_lea.vmem %s718_s0, %s541_s29  ;;  %s299_s13 = scalar_lea.vmem %s719_s1, %s541_s29  ;;  %v548_v6 = vld [vmem:[%s723_s5 + $0x4] sm:$0xf]  ;;  %v309_v10 = vld [vmem:[%s720_s2] sm:$0x3]  ;;  %vm311_vm2 = vcmask 31744   ;;  %vm421_vm3 = vcmask 519168  }
   0xf   : > { %596 = vset.pattern.permute.xlu0 %v624_v3  ;;  %597 = vset.pattern.permute.xlu1 %v624_v3  ;;  %v310_v5 = vld [vmem:[%s292_s8] sm:$0x3]  ;;  %s552_s20 = sshll.u32 %s730_s21, 3 }
  0x10   : > { %410 = vperm.xlu0 %596, %v407_v1   ;;  %417 = vperm.xlu1 %597, %v414_v2   ;;  %v317_v7 = vsel %vm315_vm1, %v310_v5, 0  ;;  %v360_v8 = vld [vmem:[%s299_s13] sm:$0x3]  ;;  %s307_s27 = scalar_lea.vmem %s724_s6, %s552_s20 }
  0x11   : > { %558 = vmatpush3.bf16.msra.mxu0 %v317_v7  ;;  %v365_v9 = vsel %vm315_vm1, %v360_v8, 0  ;;  %v359_v11 = vld [vmem:[%s721_s3] sm:$0x3] }
  0x12   : > { %564 = vmatpush3.bf16.msra.mxu1 %v365_v9 }
  0x14   : > { %427 = vperm.xlu0 %596, %v547_v4   ;;  %435 = vperm.xlu1 %597, %v548_v6  }
  0x15   : > { %560 = vmatmul.mubr.msk.bf16.vlgmr.msra.gmra.mxu0 %vm311_vm2, %v309_v10  ;;  %566 = vmatmul.mubr.msk.bf16.vlgmr.msra.gmra.mxu1 %vm311_vm2, %v359_v11 }
  0x8b   : > { %v411_v12 = vpop.permute.xlu0 %410  ;;  %v418_v13 = vpop.permute.xlu1 %417 }
  0x8f   : > { %v428_v15 = vpop.permute.xlu0 %427  ;;  %v436_v20 = vpop.permute.xlu1 %435 }
  0xd5   : > { %v353_v14 = vpop.f32.mrf.mxu0  ;;  %v401_v17 = vpop.f32.mrf.mxu1 }
  0xd6   : > { %v413_v16 = vmul.f32 %v411_v12, %v353_v14  ;;  %v430_v18 = vmul.f32 %v428_v15, %v401_v17 }
  0xd7   : > { %v561_v19 = vpop.f32.mrf.mxu0  ;;  %v567_v22 = vpop.f32.mrf.mxu1 }
  0xd8   : > { %v420_v21 = vadd.f32 %v418_v13, %v413_v16  ;;  %v438_v23 = vadd.f32 %v436_v20, %v430_v18 }
  0xd9   : > { %v356_v24 = vpop.f32.mrf.mxu0  ;;  %v404_v25 = vpop.f32.mrf.mxu1 }
  0xda   : > { %422 = vst.msk [vmem:[%s307_s27] sm:$0xf] %vm421_vm3, %v420_v21  ;;  %549 = vst.msk [vmem:[%s307_s27 + $0x4] sm:$0xf] %vm421_vm3, %v438_v23 }
  0xdb   : > { %v562_v26 = vpop.f32.mrf.mxu0  ;;  %v568_v27 = vpop.f32.mrf.mxu1 }
  0xdc PF: > { %s16_s23 = sadd.s32 1, %s620_s23   ;;  %s725_s21 = smov %s616_s22 }
  0xdd   : > { %p13_p5 = scmp.ge.s32.totalorder %s16_s23, 4   ;;  %s726_s22 = smov %s728_s24 }
  0xdf   :  { %15 = sbr.rel (!%p13_p5) target bundleno = 2 (0x2), region = 80 }

</bundles_post_ra>
